<compile_context>
chip_gen: v5e
topology: v5e:2x2
jax: 0.10.0
libtpu: 0.0.40
codegen_flags: <defaults>
</compile_context>

<pallas_src>
import jax
import jax.numpy as jnp
from jax.experimental import pallas as pl
from jax.experimental.pallas import tpu as pltpu


_SUBLANE = {4: 8, 2: 16, 1: 32}  # sublane rounding per dtype itemsize


def _tv_loss_ref(x, tv_loss_weight=1.0):
    """Pure-JAX reference mirroring the PyTorch TVLoss.forward."""
    b, c, h, w = x.shape
    count_h = (h - 1) * w
    count_w = h * (w - 1)
    xf = x.astype(jnp.float32)
    h_tv = jnp.sum((xf[:, :, 1:, :] - xf[:, :, :-1, :]) ** 2)
    w_tv = jnp.sum((xf[:, :, :, 1:] - xf[:, :, :, :-1]) ** 2)
    return tv_loss_weight * 2.0 * (h_tv / count_h + w_tv / count_w) / b


def _tv_kernel(vmask_ref, x_ref, h_out_ref, w_out_ref):
    # x_ref:     (tr, W)     stacked image rows (one per sublane row), any float dtype
    # vmask_ref: (tr, 1) f32 1.0 where row r and row r+1 form a valid vertical pair
    # *_out_ref: (1, 8, 128) per-block partial sums (scalar splat, lane-dense write)
    x = x_ref[...].astype(jnp.float32)

    # Horizontal neighbours: lane-axis shift.  Every (w, w+1) pair lies inside
    # one image row (W is the full lane extent), so no mask is needed; padded
    # rows are all-zero and contribute nothing.
    dw = x[:, 1:] - x[:, :-1]
    w_sum = jnp.sum(dw * dw)

    # Vertical neighbours: sublane-axis shift.  Pairs that cross an image-plane
    # boundary (or reach into zero padding) are removed by the precomputed mask.
    dh = x[1:, :] - x[:-1, :]
    vm = vmask_ref[...]
    h_sum = jnp.sum(dh * dh * vm[:-1, :])

    h_out_ref[0] = jnp.full((8, 128), h_sum, dtype=jnp.float32)
    w_out_ref[0] = jnp.full((8, 128), w_sum, dtype=jnp.float32)


def _auto_block_bytes(itemsize):
    """Pick a per-step input-block budget from the chip's physical VMEM."""
    vmem_cap = 64 * 1024 * 1024  # conservative fallback (v7x per-TC VMEM)
    try:
        vmem_cap = int(pltpu.get_tpu_info().vmem_capacity_bytes)
    except Exception:
        pass
    vmem_cap = max(vmem_cap, 32 * 1024 * 1024)
    # Per-step live set ~= 2 x input block (double buffered, input dtype)
    #                    + ~4 x block in f32 (cast copy + shifted-diff temps).
    per_elem = 2 * itemsize + 4 * 4
    blk_elems = (vmem_cap // 2) // per_elem     # stay within ~half of physical VMEM
    blk_bytes = blk_elems * itemsize
    return int(min(8 << 20, max(512 << 10, blk_bytes))), vmem_cap


def _pick_rows_per_block(n_rows, w, itemsize, block_bytes):
    """Rows of W pixels per grid block: sublane-aligned, VMEM-sized, >=2 blocks."""
    sub = _SUBLANE.get(itemsize, 8)
    bytes_per_row = max(1, w * itemsize)
    rows = block_bytes // bytes_per_row
    if rows >= n_rows:
        if n_rows >= 2 * sub:
            # Cap at ~n_rows/2 (rounded up to the sublane multiple) so the
            # "parallel" grid axis spans both TensorCores on megacore / v7x.
            tr = ((((n_rows + 1) // 2) + sub - 1) // sub) * sub
        else:
            tr = n_rows
    else:
        tr = max(sub, (rows // sub) * sub)
    return min(tr, n_rows), sub


def tv_loss(x, tv_loss_weight=1.0, *, block_bytes=None):
    """Total-variation loss matching TVLoss.forward. x: (B, C, H, W) -> scalar f32."""
    b, c, h, w = x.shape
    count_h = (h - 1) * w
    count_w = h * (w - 1)
    if h < 2 or w < 2:
        # Degenerate spatial dims: match the PyTorch module (division by zero).
        return _tv_loss_ref(x, tv_loss_weight)

    n = b * c
    n_rows = n * h                      # total number of image rows
    itemsize = x.dtype.itemsize

    auto_bytes, vmem_cap = _auto_block_bytes(itemsize)
    if block_bytes is None:
        block_bytes = auto_bytes
    tr, _ = _pick_rows_per_block(n_rows, w, itemsize, block_bytes)
    nb = -(-n_rows // tr)
    rows_pad = nb * tr

    xr = x.reshape(n_rows, w)
    x2 = xr if rows_pad == n_rows else jnp.pad(xr, ((0, rows_pad - n_rows), (0, 0)))

    # Vertical-pair validity: row r pairs with row r+1 iff both rows belong to
    # the same (b, c) image plane and r+1 is a real (non-padded) row.
    r_idx = jnp.arange(rows_pad, dtype=jnp.int32)
    vmask = (((r_idx % h) != (h - 1)) & (r_idx < (n_rows - 1)))
    vmask = vmask.astype(jnp.float32).reshape(rows_pad, 1)

    # VMEM budget: input block (double-buffered) + f32 cast/diff temporaries.
    blk_in = tr * w * itemsize
    blk_f32 = tr * w * 4
    vmem_limit = max(16 << 20, 2 * blk_in + 4 * blk_f32 + (4 << 20))
    vmem_limit = int(min(vmem_limit, (vmem_cap * 9) // 10))

    cost = pl.CostEstimate(
        flops=6 * rows_pad * w,
        transcendentals=0,
        bytes_accessed=rows_pad * w * itemsize + rows_pad * 4 + nb * 2 * 8 * 128 * 4,
    )

    h_part, w_part = pl.pallas_call(
        _tv_kernel,
        out_shape=(
            jax.ShapeDtypeStruct((nb, 8, 128), jnp.float32),
            jax.ShapeDtypeStruct((nb, 8, 128), jnp.float32),
        ),
        grid_spec=pltpu.PrefetchScalarGridSpec(
            num_scalar_prefetch=0,
            grid=(nb,),
            in_specs=[
                pl.BlockSpec((tr, 1), lambda i: (i, 0)),   # vertical-pair mask
                pl.BlockSpec((tr, w), lambda i: (i, 0)),   # image-row slab
            ],
            out_specs=[
                pl.BlockSpec((1, 8, 128), lambda i: (i, 0, 0)),
                pl.BlockSpec((1, 8, 128), lambda i: (i, 0, 0)),
            ],
        ),
        compiler_params=pltpu.CompilerParams(
            dimension_semantics=("parallel",),   # independent blocks (megacore/v7x)
            vmem_limit_bytes=vmem_limit,
        ),
        cost_estimate=cost,
    )(vmask, x2)

    h_tv = jnp.sum(h_part[:, 0, 0])
    w_tv = jnp.sum(w_part[:, 0, 0])

    # Vertical pairs that straddle a row-block boundary (only when one image
    # plane is split across blocks): a handful of thin rows, done in plain JAX.
    boundary = [j * tr - 1 for j in range(1, nb)
                if ((j * tr - 1) % h) != (h - 1) and (j * tr) <= (n_rows - 1)]
    if boundary:
        idx = jnp.asarray(boundary, dtype=jnp.int32)
        lo = jnp.take(xr, idx, axis=0).astype(jnp.float32)
        hi = jnp.take(xr, idx + 1, axis=0).astype(jnp.float32)
        h_tv = h_tv + jnp.sum((hi - lo) ** 2)

    return tv_loss_weight * 2.0 * (h_tv / count_h + w_tv / count_w) / b


if __name__ == "__main__":
    key = jax.random.PRNGKey(0)
    k1, k2, k3, k4 = jax.random.split(key, 4)

    # Primary shape implied by the module (batch=2, channels=4, 16x16 planes).
    x1 = jax.random.normal(k1, (2, 4, 16, 16), dtype=jnp.float32)
    out1 = jax.block_until_ready(jax.jit(tv_loss)(x1))
    ref1 = _tv_loss_ref(x1)
    assert jnp.allclose(out1, ref1, rtol=1e-5, atol=1e-5), (out1, ref1)

    # Multiple planes per block -> exercises the in-kernel plane-boundary mask.
    x2 = jax.random.normal(k2, (2, 2, 4, 128), dtype=jnp.float32)
    out2 = jax.block_until_ready(jax.jit(tv_loss)(x2))
    ref2 = _tv_loss_ref(x2)
    assert jnp.allclose(out2, ref2, rtol=1e-5, atol=1e-5), (out2, ref2)

    # Forced tiny blocks -> exercises H tiling + the cross-block correction.
    x3 = jax.random.normal(k3, (1, 2, 16, 128), dtype=jnp.float32)
    out3 = jax.block_until_ready(
        jax.jit(lambda v: tv_loss(v, block_bytes=8 * 128 * 4))(x3))
    ref3 = _tv_loss_ref(x3)
    assert jnp.allclose(out3, ref3, rtol=1e-5, atol=1e-5), (out3, ref3)

    # bf16 input -> exercises the dtype-aware sublane rounding / f32 accumulation.
    x4 = jax.random.normal(k4, (2, 2, 8, 128), dtype=jnp.float32).astype(jnp.bfloat16)
    out4 = jax.block_until_ready(jax.jit(tv_loss)(x4))
    ref4 = _tv_loss_ref(x4)
    assert jnp.allclose(out4, ref4, rtol=1e-4, atol=1e-4), (out4, ref4)

    print("KERNEL_OK")
</pallas_src>

<mosaic_0001>
module attributes {stable_mosaic.version = 11 : i64} {
  func.func @_tv_kernel(%arg0: i32, %arg1: memref<64x1xf32, #tpu.memory_space<vmem>>, %arg2: memref<64x16xf32, #tpu.memory_space<vmem>>, %arg3: memref<1x8x128xf32, #tpu.memory_space<vmem>>, %arg4: memref<1x8x128xf32, #tpu.memory_space<vmem>>) attributes {dimension_semantics = [#tpu.dimension_semantics<parallel>], iteration_bounds = array<i64: 2>, scalar_prefetch = 0 : i64, scratch_operands = 0 : i64, tpu.core_type = #tpu.core_type<tc>, window_params = [{transform_indices = @transform_0, window_bounds = array<i64: 64, 1>}, {transform_indices = @transform_1, window_bounds = array<i64: 64, 16>}, {transform_indices = @transform_2, window_bounds = array<i64: 1, 8, 128>}, {transform_indices = @transform_3, window_bounds = array<i64: 1, 8, 128>}]} {
    %c0 = arith.constant 0 : index
    %c0_0 = arith.constant 0 : index
    %0 = vector.load %arg2[%c0, %c0_0] : memref<64x16xf32, #tpu.memory_space<vmem>>, vector<64x16xf32>
    %1 = vector.extract_strided_slice %0 {offsets = [0, 1], sizes = [64, 15], strides = [1, 1]} : vector<64x16xf32> to vector<64x15xf32>
    %2 = vector.extract_strided_slice %0 {offsets = [0, 0], sizes = [64, 15], strides = [1, 1]} : vector<64x16xf32> to vector<64x15xf32>
    %3 = arith.subf %1, %2 : vector<64x15xf32>
    %4 = arith.mulf %3, %3 : vector<64x15xf32>
    %5 = vector.shape_cast %4 : vector<64x15xf32> to vector<1x64x15xf32>
    %cst = arith.constant dense<0.000000e+00> : vector<1xf32>
    %6 = vector.multi_reduction <add>, %5, %cst [1, 2] : vector<1x64x15xf32> to vector<1xf32>
    %7 = vector.shape_cast %6 : vector<1xf32> to vector<1x1x1xf32>
    %8 = vector.extract %7[0, 0, 0] : f32 from vector<1x1x1xf32>
    %9 = vector.extract_strided_slice %0 {offsets = [1, 0], sizes = [63, 16], strides = [1, 1]} : vector<64x16xf32> to vector<63x16xf32>
    %10 = vector.extract_strided_slice %0 {offsets = [0, 0], sizes = [63, 16], strides = [1, 1]} : vector<64x16xf32> to vector<63x16xf32>
    %11 = arith.subf %9, %10 : vector<63x16xf32>
    %c0_1 = arith.constant 0 : index
    %c0_2 = arith.constant 0 : index
    %12 = vector.load %arg1[%c0_1, %c0_2] : memref<64x1xf32, #tpu.memory_space<vmem>>, vector<64x1xf32>
    %13 = arith.mulf %11, %11 : vector<63x16xf32>
    %14 = vector.extract_strided_slice %12 {offsets = [0, 0], sizes = [63, 1], strides = [1, 1]} : vector<64x1xf32> to vector<63x1xf32>
    %15 = vector.broadcast %14 : vector<63x1xf32> to vector<63x16xf32>
    %16 = arith.mulf %13, %15 : vector<63x16xf32>
    %17 = vector.shape_cast %16 : vector<63x16xf32> to vector<1x63x16xf32>
    %cst_3 = arith.constant dense<0.000000e+00> : vector<1xf32>
    %18 = vector.multi_reduction <add>, %17, %cst_3 [1, 2] : vector<1x63x16xf32> to vector<1xf32>
    %19 = vector.shape_cast %18 : vector<1xf32> to vector<1x1x1xf32>
    %20 = vector.extract %19[0, 0, 0] : f32 from vector<1x1x1xf32>
    %21 = vector.broadcast %20 : f32 to vector<8x128xf32>
    %c0_4 = arith.constant 0 : index
    %c0_5 = arith.constant 0 : index
    %c0_6 = arith.constant 0 : index
    %22 = vector.load %arg3[%c0_4, %c0_5, %c0_6] : memref<1x8x128xf32, #tpu.memory_space<vmem>>, vector<1x8x128xf32>
    %23 = vector.shape_cast %22 : vector<1x8x128xf32> to vector<8x128xf32>
    %24 = vector.shape_cast %21 : vector<8x128xf32> to vector<1x8x128xf32>
    tpu.vector_store %arg3[%c0_4, %c0_5, %c0_6], %24 {strides = array<i32>} : memref<1x8x128xf32, #tpu.memory_space<vmem>>, vector<1x8x128xf32>,
    %25 = vector.broadcast %8 : f32 to vector<8x128xf32>
    %c0_7 = arith.constant 0 : index
    %c0_8 = arith.constant 0 : index
    %c0_9 = arith.constant 0 : index
    %26 = vector.load %arg4[%c0_7, %c0_8, %c0_9] : memref<1x8x128xf32, #tpu.memory_space<vmem>>, vector<1x8x128xf32>
    %27 = vector.shape_cast %26 : vector<1x8x128xf32> to vector<8x128xf32>
    %28 = vector.shape_cast %25 : vector<8x128xf32> to vector<1x8x128xf32>
    tpu.vector_store %arg4[%c0_7, %c0_8, %c0_9], %28 {strides = array<i32>} : memref<1x8x128xf32, #tpu.memory_space<vmem>>, vector<1x8x128xf32>,
    return
  }
  func.func @transform_0(%arg0: i32) -> (i32, i32) {
    %c0_i32 = arith.constant 0 : i32
    %c0_i32_0 = arith.constant 0 : i32
    return %arg0, %c0_i32 : i32, i32
  }
  func.func @transform_1(%arg0: i32) -> (i32, i32) {
    %c0_i32 = arith.constant 0 : i32
    %c0_i32_0 = arith.constant 0 : i32
    return %arg0, %c0_i32 : i32, i32
  }
  func.func @transform_2(%arg0: i32) -> (i32, i32, i32) {
    %c0_i32 = arith.constant 0 : i32
    %c0_i32_0 = arith.constant 0 : i32
    %c0_i32_1 = arith.constant 0 : i32
    return %arg0, %c0_i32, %c0_i32_0 : i32, i32, i32
  }
  func.func @transform_3(%arg0: i32) -> (i32, i32, i32) {
    %c0_i32 = arith.constant 0 : i32
    %c0_i32_0 = arith.constant 0 : i32
    %c0_i32_1 = arith.constant 0 : i32
    return %arg0, %c0_i32, %c0_i32_0 : i32, i32, i32
  }
}

</mosaic_0001>

<bundles_post_ra>
// kernel: tv_loss.1
= control target key start
LH: loop header
LB: loop body
LE: loop exit
PB: predicated region body
PF: predicated region fallthrough
CT: control target
= control target key end

     0   :  { %s648_s12 = smov 0   ;;  %s768_s0 = inlined_call_operand.vmem [shape: f32[128,1], index: 0, kind: input, shape index: {}]   ;;  %s769_s1 = inlined_call_operand.vmem [shape: f32[128,16], index: 1, kind: input, shape index: {}]   ;;  %s770_s2 = inlined_call_operand.vmem [shape: f32[2,8,128], index: 2, kind: output, shape index: {0}]   ;;  %s771_s3 = inlined_call_operand.vmem [shape: f32[2,8,128], index: 3, kind: output, shape index: {1}]  }
   0x1 LB: > { %s654_s13 = sadd.s32 4294967295, %s623_s12   ;;  %p590_p0 = scmp.ge.s32.totalorder %s623_s12, 1  ;;  %s623_s12 = sphi %s648_s12, %s14_s12  }
   0x2   : > { %p152_p1 = scmp.lt.s32.totalorder %s623_s12, 3 }
   0x4   : > { %p153_p2 = pnand %p590_p0, %p152_p1 }
   0x5   : > { %s591_s14 = sshll.u32 (!%p153_p2), %s654_s13, 3  ;;  %s626_s19 = smov (!%p153_p2), 1  }
   0x6   : > { %156 = sbr.rel (%p153_p2) target bundleno = 457 (0x1c9), region = 28  ;;  %p185_p3 = scmp.lt.s32.totalorder (!%p153_p2), %s591_s14, 15 }
   0x7   : > { %s627_s23 = smov (!%p153_p2), 127   ;;  %p196_p4 = scmp.lt.s32.totalorder (!%p153_p2), %s654_s13, 1 }
   0xb   : > { %v625_v0 = vmov 0   ;;  %s773_s14 = smov (!%p185_p3, %s591_s14), 15  ;;  %vm317_vm0 = vcmask 1040384   ;;  %vm436_vm1 = vcmask 1046528   ;;  %vm460_vm2 = vcmask 130048   ;;  %s775_s13 = smov (!%p196_p4, %s654_s13), 1 }
   0xc   : > { %616 = vset.pattern.permute.xlu1 %v625_v0  ;;  %615 = vset.pattern.permute.xlu0 %v625_v0  ;;  %s592_s15 = sshll.u32 %s773_s14, 3  ;;  %vm474_vm3 = vcmask 129024   ;;  %vm292_vm4 = vcmask 121856   ;;  %s595_s24 = sshll.u32 %s775_s13, 3 }
   0xd   : > { %614 = vset.pattern.permute.xlu2 %v625_v0  ;;  %s194_s18 = scalar_lea.vmem %s769_s1, %s592_s15  ;;  %s188_s22 = scalar_lea.vmem %s768_s0, %s592_s15 }
   0xe   : > { %v662_v1 = vld [vmem:[%s194_s18] sm:$0xff]  ;;  %v664_v2 = vld [vmem:[%s194_s18 + $0x10] sm:$0xff]  ;;  %v671_v4 = vld [vmem:[%s194_s18 + $0x8] sm:$0xff]  ;;  %s203_s27 = scalar_lea.vmem %s771_s3, %s595_s24  ;;  %s199_s4 = scalar_lea.vmem %s770_s2, %s595_s24 }
   0xf   : > { %220 = vrot.lane.b32.xlu0 %v662_v1, %s626_s19  ;;  %224 = vrot.lane.b32.xlu1 %v664_v2, %s626_s19  ;;  %v668_v3 = vld [vmem:[%s194_s18 + $0x20] sm:$0xff]  ;;  %v673_v5 = vld [vmem:[%s194_s18 + $0x18] sm:$0xff]  ;;  %v321_v41 = vrot.slane %v664_v2, 7  ;;  %v319_v42 = vrot.slane %v671_v4, 7  ;;  %v318_v43 = vrot.slane %v662_v1, 7 }
  0x10   : > { %228 = vrot.lane.b32.xlu2 %v668_v3, %s626_s19  ;;  %v675_v6 = vld [vmem:[%s194_s18 + $0x28] sm:$0xff]  ;;  %v680_v7 = vld [vmem:[%s194_s18 + $0x38] sm:$0xff]  ;;  %v682_v8 = vld [vmem:[%s194_s18 + $0x30] sm:$0xff]  ;;  %v323_v45 = vrot.slane %v673_v5, 7  ;;  %v325_v50 = vrot.slane %v668_v3, 7 }
  0x11   : > { %v349_v9 = vld [vmem:[%s188_s22] sm:$0xff]  ;;  %v351_v10 = vld [vmem:[%s188_s22 + $0x10] sm:$0xff]  ;;  %v350_v11 = vld [vmem:[%s188_s22 + $0x8] sm:$0xff]  ;;  %v320_v46 = vsel %vm317_vm0, %v318_v43, %v319_v42  ;;  %v322_v47 = vsel %vm317_vm0, %v319_v42, %v321_v41  ;;  %v341_v52 = vsub.f32 %v662_v1, %v318_v43  ;;  %v327_v60 = vrot.slane %v675_v6, 7 }
  0x12   : > { %v352_v12 = vld [vmem:[%s188_s22 + $0x18] sm:$0xff]  ;;  %v353_v13 = vld [vmem:[%s188_s22 + $0x20] sm:$0xff]  ;;  %v354_v14 = vld [vmem:[%s188_s22 + $0x28] sm:$0xff]  ;;  %v324_v51 = vsel %vm317_vm0, %v321_v41, %v323_v45  ;;  %v342_v53 = vsub.f32 %v671_v4, %v320_v46  ;;  %v343_v54 = vsub.f32 %v664_v2, %v322_v47  ;;  %v326_v61 = vsel %vm317_vm0, %v323_v45, %v325_v50 }
  0x13   : > { %v356_v15 = vld [vmem:[%s188_s22 + $0x38] sm:$0xff]  ;;  %v355_v16 = vld [vmem:[%s188_s22 + $0x30] sm:$0xff]  ;;  %v344_v59 = vsub.f32 %v673_v5, %v324_v51  ;;  %v357_v62 = vmul.f32 %v341_v52, %v341_v52 }
  0x14   : > { %v358_v63 = vmul.f32 %v342_v53, %v342_v53  ;;  %v359_v0 = vmul.f32 %v343_v54, %v343_v54 }
  0x17   : > { %222 = vrot.lane.b32.xlu0 %v671_v4, %s626_s19  ;;  %226 = vrot.lane.b32.xlu1 %v673_v5, %s626_s19 }
  0x18   : > { %230 = vrot.lane.b32.xlu2 %v675_v6, %s626_s19 }
  0x1f   : > { %234 = vrot.lane.b32.xlu1 %v680_v7, %s626_s19  ;;  %232 = vrot.lane.b32.xlu0 %v682_v8, %s626_s19 }
  0x20   : > { %367 = vperm.xlu2 %614, %v349_v9  }
  0x27   : > { %375 = vperm.xlu1 %616, %v351_v10   ;;  %371 = vperm.xlu0 %615, %v350_v11   ;;  %v328_v10 = vsel %vm317_vm0, %v325_v50, %v327_v60 }
  0x28   : > { %379 = vperm.xlu2 %614, %v352_v12   ;;  %v360_v12 = vmul.f32 %v344_v59, %v344_v59 }
  0x2f   : > { %383 = vperm.xlu1 %616, %v353_v13  }
  0x30   : > { %387 = vperm.xlu2 %614, %v354_v14  }
  0x37   : > { %395 = vperm.xlu1 %616, %v356_v15  }
  0x38   : > { %391 = vperm.xlu2 %614, %v355_v16  }
  0x6a   : > { %v229_v17 = vpop.permute.xlu2 %228 }
  0x6b   : > { %v248_v32 = vsub.f32 %v668_v3, %v229_v17  ;;  %v346_v17 = vsub.f32 %v675_v6, %v328_v10 }
  0x6d   : > { %v256_v37 = vmul.f32 %v248_v32, %v248_v32 }
  0x72   : > { %v231_v28 = vpop.permute.xlu2 %230 }
  0x73   : > { %v249_v31 = vsub.f32 %v675_v6, %v231_v28  ;;  %v331_v6 = vrot.slane %v680_v7, 7 }
  0x75   : > { %v257_v34 = vmul.f32 %v249_v31, %v249_v31 }
  0x7a   : > { %v368_v40 = vpop.permute.xlu2 %367 }
  0x7b   : > { %v397_v55 = vrot.slane %v368_v40, 7 }
  0x7d   : > { %v420_v11 = vmul.f32 %v397_v55, %v357_v62 }
  0x81   : > { %v221_v18 = vpop.permute.xlu0 %220  ;;  %v225_v19 = vpop.permute.xlu1 %224 }
  0x82   : > { %v244_v20 = vsub.f32 %v662_v1, %v221_v18  ;;  %v246_v22 = vsub.f32 %v664_v2, %v225_v19  ;;  %v380_v58 = vpop.permute.xlu2 %379  ;;  %v345_v2 = vsub.f32 %v668_v3, %v326_v61  ;;  %v437_v19 = vrot.slane %v420_v11, 1 }
  0x83   : > { %v402_v9 = vrot.slane %v380_v58, 7 }
  0x84   : > { %v252_v21 = vmul.f32 %v244_v20, %v244_v20  ;;  %v254_v25 = vmul.f32 %v246_v22, %v246_v22  ;;  %v361_v18 = vmul.f32 %v345_v2, %v345_v2 }
  0x86   : > { %268 = vrot.lane.b32.xlu0 %v252_v21, %s627_s23 }
  0x89   : > { %v223_v23 = vpop.permute.xlu0 %222  ;;  %v227_v24 = vpop.permute.xlu1 %226 }
  0x8a   : > { %v245_v26 = vsub.f32 %v671_v4, %v223_v23  ;;  %v247_v27 = vsub.f32 %v673_v5, %v227_v24  ;;  %v388_v23 = vpop.permute.xlu2 %387 }
  0x8b   : > { %v406_v3 = vrot.slane %v388_v23, 7 }
  0x8c   : > { %v253_v29 = vmul.f32 %v245_v26, %v245_v26  ;;  %v255_v30 = vmul.f32 %v247_v27, %v247_v27 }
  0x8e   : > { %270 = vrot.lane.b32.xlu1 %v253_v29, %s627_s23  ;;  %272 = vrot.lane.b32.xlu0 %v254_v25, %s627_s23  ;;  %v362_v25 = vmul.f32 %v346_v17, %v346_v17 }
  0x8f   : > { %274 = vrot.lane.b32.xlu2 %v255_v30, %s627_s23  ;;  %v329_v30 = vrot.slane %v682_v8, 7 }
  0x91   : > { %v233_v33 = vpop.permute.xlu0 %232  ;;  %v235_v36 = vpop.permute.xlu1 %234 }
  0x92   : > { %v250_v35 = vsub.f32 %v682_v8, %v233_v33  ;;  %v251_v39 = vsub.f32 %v680_v7, %v235_v36  ;;  %v392_v50 = vpop.permute.xlu2 %391 }
  0x93   : > { %v408_v53 = vrot.slane %v392_v50, 7 }
  0x94   : > { %v258_v38 = vmul.f32 %v250_v35, %v250_v35  ;;  %v259_v44 = vmul.f32 %v251_v39, %v251_v39 }
  0x96   : > { %276 = vrot.lane.b32.xlu0 %v256_v37, %s627_s23  ;;  %278 = vrot.lane.b32.xlu1 %v257_v34, %s627_s23  ;;  %v330_v37 = vsel %vm317_vm0, %v327_v60, %v329_v30 }
  0x97   : > { %280 = vrot.lane.b32.xlu2 %v258_v38, %s627_s23  ;;  %v332_v38 = vsel %vm317_vm0, %v329_v30, %v331_v6  ;;  %v347_v41 = vsub.f32 %v682_v8, %v330_v37 }
  0x98   : > { %v348_v45 = vsub.f32 %v680_v7, %v332_v38 }
  0x99   : > { %v376_v48 = vpop.permute.xlu1 %375  ;;  %v372_v49 = vpop.permute.xlu0 %371 }
  0x9a   : > { %v400_v56 = vrot.slane %v376_v48, 7  ;;  %v398_v57 = vrot.slane %v372_v49, 7  ;;  %v363_v49 = vmul.f32 %v347_v41, %v347_v41  ;;  %v364_v51 = vmul.f32 %v348_v45, %v348_v45 }
  0x9c   : > { %v399_v1 = vsel %vm317_vm0, %v397_v55, %v398_v57  ;;  %v401_v4 = vsel %vm317_vm0, %v398_v57, %v400_v56  ;;  %v403_v15 = vsel %vm317_vm0, %v400_v56, %v402_v9  ;;  %v409_v55 = vsel %vm317_vm0, %v406_v3, %v408_v53 }
  0x9d   : > { %v421_v13 = vmul.f32 %v399_v1, %v358_v63  ;;  %v422_v5 = vmul.f32 %v401_v4, %v359_v0  ;;  %v423_v20 = vmul.f32 %v403_v15, %v360_v12  ;;  %v426_v57 = vmul.f32 %v409_v55, %v363_v49 }
  0x9e   : > { %282 = vrot.lane.b32.xlu0 %v259_v44, %s627_s23 }
  0x9f   : > { %v438_v21 = vrot.slane %v421_v13, 1  ;;  %v440_v22 = vrot.slane %v422_v5, 1  ;;  %v442_v26 = vrot.slane %v423_v20, 1  ;;  %v448_v7 = vrot.slane %v426_v57, 1 }
  0xa1   : > { %v384_v14 = vpop.permute.xlu1 %383  ;;  %v439_v27 = vsel %vm436_vm1, %v437_v19, %v438_v21  ;;  %v441_v28 = vsel %vm436_vm1, %v438_v21, %v440_v22  ;;  %v443_v34 = vsel %vm436_vm1, %v440_v22, %v442_v26 }
  0xa2   : > { %v404_v16 = vrot.slane %v384_v14, 7  ;;  %v461_v32 = vsel %vm460_vm2, %v439_v27, 0.0  ;;  %v462_v33 = vsel %vm460_vm2, %v441_v28, 0.0  ;;  %v464_v40 = vsel %vm460_vm2, %v443_v34, 0.0 }
  0xa3   : > { %v463_v39 = vadd.f32 %v462_v33, %v461_v32 }
  0xa4   : > { %v405_v24 = vsel %vm317_vm0, %v402_v9, %v404_v16  ;;  %v407_v31 = vsel %vm317_vm0, %v404_v16, %v406_v3 }
  0xa5   : > { %v424_v29 = vmul.f32 %v405_v24, %v361_v18  ;;  %v425_v35 = vmul.f32 %v407_v31, %v362_v25  ;;  %v465_v46 = vadd.f32 %v464_v40, %v463_v39 }
  0xa7   : > { %v444_v36 = vrot.slane %v424_v29, 1  ;;  %v446_v43 = vrot.slane %v425_v35, 1 }
  0xa9   : > { %v445_v42 = vsel %vm436_vm1, %v442_v26, %v444_v36  ;;  %v396_v44 = vpop.permute.xlu1 %395  ;;  %v447_v52 = vsel %vm436_vm1, %v444_v36, %v446_v43  ;;  %v449_v61 = vsel %vm436_vm1, %v446_v43, %v448_v7 }
  0xaa   : > { %v410_v47 = vrot.slane %v396_v44, 7  ;;  %v466_v48 = vsel %vm460_vm2, %v445_v42, 0.0  ;;  %v468_v56 = vsel %vm460_vm2, %v447_v52, 0.0  ;;  %v470_v63 = vsel %vm460_vm2, %v449_v61, 0.0 }
  0xab   : > { %v467_v54 = vadd.f32 %v466_v48, %v465_v46 }
  0xac   : > { %v411_v8 = vsel %vm317_vm0, %v408_v53, %v410_v47 }
  0xad   : > { %v427_v58 = vmul.f32 %v411_v8, %v364_v51  ;;  %v469_v60 = vadd.f32 %v468_v56, %v467_v54 }
  0xaf   : > { %v450_v59 = vrot.slane %v427_v58, 1  ;;  %v471_v9 = vadd.f32 %v470_v63, %v469_v60 }
  0xb1   : > { %v451_v62 = vsel %vm436_vm1, %v448_v7, %v450_v59  ;;  %v475_v1 = vsel %vm474_vm3, %v450_v59, 0.0 }
  0xb2   : > { %v472_v0 = vsel %vm460_vm2, %v451_v62, 0.0 }
  0xb3   : > { %v473_v4 = vadd.f32 %v472_v0, %v471_v9 }
  0xb5   : > { %v476_v2 = vadd.f32 %v475_v1, %v473_v4 }
  0xc0   : > { %477 = vadd.xlane.f32.xlu2 %v476_v2 }
  0xe9   : > { %v275_v14 = vpop.permute.xlu2 %274 }
  0xea   : > { %v298_v18 = vsel %vm292_vm4, %v275_v14, 0.0 }
  0xf1   : > { %v281_v24 = vpop.permute.xlu2 %280 }
  0xf2   : > { %v304_v26 = vsel %vm292_vm4, %v281_v24, 0.0 }
  0xf8   : > { %v269_v10 = vpop.permute.xlu0 %268 }
  0xf9   : > { %v293_v13 = vsel %vm292_vm4, %v269_v10, 0.0 }
 0x100   : > { %v271_v11 = vpop.permute.xlu1 %270  ;;  %v273_v12 = vpop.permute.xlu0 %272 }
 0x101   : > { %v294_v5 = vsel %vm292_vm4, %v271_v11, 0.0  ;;  %v296_v16 = vsel %vm292_vm4, %v273_v12, 0.0 }
 0x102   : > { %v295_v15 = vadd.f32 %v294_v5, %v293_v13 }
 0x104   : > { %v297_v17 = vadd.f32 %v296_v16, %v295_v15 }
 0x106   : > { %v299_v20 = vadd.f32 %v298_v18, %v297_v17 }
 0x108   : > { %v277_v19 = vpop.permute.xlu0 %276  ;;  %v279_v21 = vpop.permute.xlu1 %278 }
 0x109   : > { %v300_v22 = vsel %vm292_vm4, %v277_v19, 0.0  ;;  %v302_v23 = vsel %vm292_vm4, %v279_v21, 0.0 }
 0x10a   : > { %v301_v3 = vadd.f32 %v300_v22, %v299_v20 }
 0x10c   : > { %v303_v25 = vadd.f32 %v302_v23, %v301_v3 }
 0x10e   : > { %v305_v27 = vadd.f32 %v304_v26, %v303_v25 }
 0x110   : > { %v283_v28 = vpop.permute.xlu0 %282 }
 0x111   : > { %v306_v29 = vsel %vm292_vm4, %v283_v28, 0.0 }
 0x112   : > { %v307_v6 = vadd.f32 %v306_v29, %v305_v27 }
 0x114   : > { %308 = vadd.xlane.f32.xlu1 %v307_v6 }
 0x133   : > { %v478_v30 = vpop.xlane.xlu2 %477 }
 0x134   : > { %v479_v31 = vrot.slane %v478_v30, 4 }
 0x136   : > { %v480_v32 = vadd.f32 %v479_v31, %v478_v30 }
 0x138   : > { %v481_v33 = vrot.slane %v480_v32, 2 }
 0x13a   : > { %v482_v37 = vadd.f32 %v481_v33, %v480_v32 }
 0x13c   : > { %v483_v40 = vrot.slane %v482_v37, 1 }
 0x13e   : > { %v484_v43 = vadd.f32 %v483_v40, %v482_v37 }
 0x187   : > { %v309_v34 = vpop.xlane.xlu1 %308 }
 0x188   : > { %v310_v35 = vrot.slane %v309_v34, 4 }
 0x18a   : > { %v311_v36 = vadd.f32 %v310_v35, %v309_v34 }
 0x18c   : > { %v312_v38 = vrot.slane %v311_v36, 2 }
 0x18e   : > { %v313_v39 = vadd.f32 %v312_v38, %v311_v36 }
 0x190   : > { %v314_v41 = vrot.slane %v313_v39, 1 }
 0x192   : > { %v315_v42 = vadd.f32 %v314_v41, %v313_v39 }
 0x194   : > { %599 = vpush %v315_v42 }
 0x195   : > { %601 = vpush %v484_v43 }
 0x1c5   : > { %s600_s28 = spop %599 }
 0x1c6   : > { %v488_v44 = vstv %s600_s28  ;;  %s602_s5 = spop %601 }
 0x1c7   : > { %489 = vst [vmem:[%s203_s27] sm:$0xff] %v488_v44  ;;  %v486_v45 = vstv %s602_s5 }
 0x1c8   : > { %487 = vst [vmem:[%s199_s4] sm:$0xff] %v486_v45 }
 0x1c9 PF: > { %s14_s12 = sadd.s32 1, %s623_s12  }
 0x1ca   : > { %p11_p5 = scmp.ge.s32.totalorder %s14_s12, 4  }
 0x1cc   :  { %13 = sbr.rel (!%p11_p5) target bundleno = 1 (0x1), region = 73 }

</bundles_post_ra>
